<compile_context>
chip_gen: v7x
topology: tpu7x:2x2x1
jax: 0.10.0
libtpu: 0.0.40
codegen_flags: <defaults>
</compile_context>

<pallas_src>
import functools

import jax
import jax.numpy as jnp
import numpy as np
from jax.experimental import pallas as pl
from jax.experimental.pallas import tpu as pltpu


def _round_up(x, m):
    return ((x + m - 1) // m) * m


def _vmem_budget_bytes():
    """Generation-aware VMEM budget (leave pipelining headroom)."""
    try:
        cap = pltpu.get_tpu_info().vmem_capacity_bytes
    except Exception:
        cap = 64 * 1024 * 1024
    # v7x: 64 MiB physical -> ~38 MiB budget; v5e/v6e: 128 MiB -> 64 MiB cap.
    return int(min(64 * 1024 * 1024, max(32 * 1024 * 1024, cap * 6 // 10)))


# ----------------------------- Pallas kernels ------------------------------ #
def _mm_bn_relu_kernel(col_ref, w_ref, bias_ref, out_ref):
    """Single-shot path (full K in one block): out = relu(col @ w + bias)."""
    acc = jnp.dot(col_ref[...], w_ref[...], preferred_element_type=jnp.float32)
    out_ref[...] = jnp.maximum(acc + bias_ref[...], 0.0).astype(out_ref.dtype)


def _mm_bn_relu_kernel_ksplit(col_ref, w_ref, bias_ref, out_ref, acc_ref):
    """K-split fallback: accumulate over grid axis 2, finalize on last step."""
    k = pl.program_id(2)

    @pl.when(k == 0)
    def _():
        acc_ref[...] = jnp.zeros_like(acc_ref)

    acc_ref[...] += jnp.dot(col_ref[...], w_ref[...],
                            preferred_element_type=jnp.float32)

    @pl.when(k == pl.num_programs(2) - 1)
    def _():
        out_ref[...] = jnp.maximum(acc_ref[...] + bias_ref[...],
                                   0.0).astype(out_ref.dtype)


# ----------------------------- tile selection ------------------------------ #
def _working_set_bytes(tm, tn, tk, with_acc):
    b = 2 * (tm * tk * 2 + tk * tn * 2 + tn * 4)   # double-buffered inputs
    b += 2 * tm * tn * 2                           # double-buffered bf16 output
    if with_acc:
        b += tm * tn * 4                           # f32 accumulator scratch
    return b


def _choose_tiles(M, Kc, OC, budget):
    oc128 = _round_up(OC, 128)
    kc128 = _round_up(Kc, 128)
    m128 = _round_up(M, 128)

    # OC tile: whole (padded) OC when it fits so the im2col matrix is streamed
    # exactly once; otherwise the largest clean 128-multiple divisor.
    if oc128 <= 512:
        tn = oc128
    else:
        tn = max(c for c in (512, 384, 256, 128) if oc128 % c == 0)

    tm = min(512, m128)

    # Prefer dropping the K reduction axis entirely whenever the full-K
    # working set fits the VMEM budget.
    tk = kc128
    while _working_set_bytes(tm, tn, tk, False) > budget and tm > 128:
        tm = max(128, _round_up(tm // 2, 128))
    if _working_set_bytes(tm, tn, tk, False) <= budget:
        use_ksplit = False
    else:
        use_ksplit = True
        tk = min(1024, kc128)
        while _working_set_bytes(tm, tn, tk, True) > budget and tk > 256:
            tk = max(128, _round_up(tk // 2, 128))
        while _working_set_bytes(tm, tn, tk, True) > budget and tm > 128:
            tm = max(128, _round_up(tm // 2, 128))

    # Megacore (v7x has 2 TCs): make sure at least one 'parallel' axis has
    # >= 2 tiles so both cores get work.
    if m128 // tm <= 1 and oc128 // tn <= 1 and tm > 128 and m128 > 128:
        tm = max(128, _round_up(tm // 2, 128))

    return tm, tn, tk, use_ksplit


# ------------------------------ matmul driver ------------------------------ #
def _matmul_bn_relu(col, w2d, bias):
    """col: (M, Kc) bf16, w2d: (Kc, OC) f32 (BN scale folded), bias: (1, OC).

    Returns (M, OC) bf16 = relu(col @ w2d + bias).
    """
    M, Kc = col.shape
    OC = w2d.shape[1]

    budget = _vmem_budget_bytes()
    tm, tn, tk, use_ksplit = _choose_tiles(M, Kc, OC, budget)

    Mp = _round_up(M, tm)
    OCp = _round_up(OC, tn)
    Kcp = _round_up(Kc, tk)

    # Zero-pad (zero contributions to the reduction).  col is already bf16.
    col_p = jnp.pad(col, ((0, Mp - M), (0, Kcp - Kc)))
    w_p = jnp.pad(w2d, ((0, Kcp - Kc), (0, OCp - OC))).astype(jnp.bfloat16)
    bias_p = jnp.pad(bias, ((0, 0), (0, OCp - OC))).astype(jnp.float32)

    cost = pl.CostEstimate(
        flops=2 * Mp * Kcp * OCp,
        transcendentals=0,
        bytes_accessed=(Mp * Kcp * 2) * (OCp // tn) + Kcp * OCp * 2
        + OCp * 4 + Mp * OCp * 2,
    )

    if not use_ksplit:
        grid = (Mp // tm, OCp // tn)
        out = pl.pallas_call(
            _mm_bn_relu_kernel,
            out_shape=jax.ShapeDtypeStruct((Mp, OCp), jnp.bfloat16),
            grid_spec=pltpu.PrefetchScalarGridSpec(
                num_scalar_prefetch=0,
                grid=grid,
                in_specs=[
                    pl.BlockSpec((tm, Kcp), lambda i, j: (i, 0)),
                    pl.BlockSpec((Kcp, tn), lambda i, j: (0, j)),
                    pl.BlockSpec((1, tn), lambda i, j: (0, j)),
                ],
                out_specs=pl.BlockSpec((tm, tn), lambda i, j: (i, j)),
            ),
            compiler_params=pltpu.CompilerParams(
                dimension_semantics=("parallel", "parallel"),
                vmem_limit_bytes=budget,
            ),
            cost_estimate=cost,
        )(col_p, w_p, bias_p)
    else:
        grid = (Mp // tm, OCp // tn, Kcp // tk)
        out = pl.pallas_call(
            _mm_bn_relu_kernel_ksplit,
            out_shape=jax.ShapeDtypeStruct((Mp, OCp), jnp.bfloat16),
            grid_spec=pltpu.PrefetchScalarGridSpec(
                num_scalar_prefetch=0,
                grid=grid,
                in_specs=[
                    pl.BlockSpec((tm, tk), lambda i, j, k: (i, k)),
                    pl.BlockSpec((tk, tn), lambda i, j, k: (k, j)),
                    pl.BlockSpec((1, tn), lambda i, j, k: (0, j)),
                ],
                out_specs=pl.BlockSpec((tm, tn), lambda i, j, k: (i, j)),
                scratch_shapes=[pltpu.VMEM((tm, tn), jnp.float32)],
            ),
            compiler_params=pltpu.CompilerParams(
                dimension_semantics=("parallel", "parallel", "arbitrary"),
                vmem_limit_bytes=budget,
            ),
            cost_estimate=cost,
        )(col_p, w_p, bias_p)

    # Padded M rows hold relu(bias) garbage and padded OC cols are zero; both
    # are sliced off here before any downstream use.
    return out[:M, :OC]


# -------------------------------- JAX glue ---------------------------------- #
def _im2col_bf16(x, kernel_size, stride, padding):
    """x: (N, C, H, W) -> bf16 (N*OH*OW, C*KH*KW), patch order (c, kh, kw)."""
    N, C, H, W = x.shape
    K = kernel_size
    OH = (H + 2 * padding - K) // stride + 1
    OW = (W + 2 * padding - K) // stride + 1
    xb = x.astype(jnp.bfloat16)
    xp = jnp.pad(xb, ((0, 0), (0, 0), (padding, padding), (padding, padding)))
    patches = []
    for kh in range(K):
        for kw in range(K):
            patches.append(
                xp[:, :, kh:kh + stride * OH:stride, kw:kw + stride * OW:stride]
            )
    # (N, C, K*K, OH, OW) with c slowest, then kh, kw — matches PyTorch
    # weight.reshape(OC, C*K*K) ordering.
    col = jnp.stack(patches, axis=2).reshape(N, C * K * K, OH, OW)
    col = col.transpose(0, 2, 3, 1).reshape(N * OH * OW, C * K * K)
    return col, OH, OW


def conv_bn_act(x, weight, gamma, beta, running_mean, running_var,
                *, stride=1, eps=1e-5):
    """Forward pass of ConvBnAct (eval-mode BN), NCHW in / NCHW out (f32)."""
    N, C, H, W = x.shape
    OC, IC, KH, KW = weight.shape
    assert IC == C and KH == KW
    K = KH
    padding = K // 2

    col, OH, OW = _im2col_bf16(x, K, stride, padding)         # (M, C*K*K) bf16

    scale = gamma / jnp.sqrt(running_var + eps)               # (OC,)
    bias = (beta - running_mean * scale).reshape(1, OC)       # (1, OC)
    # Fold BN scale into the reshaped conv weight once, outside the kernel.
    w2d = weight.reshape(OC, C * K * K).T * scale[None, :]    # (Kc, OC) f32

    y = _matmul_bn_relu(col, w2d, bias)                       # (M, OC) bf16
    # NHWC -> NCHW permute in bf16 (half the traffic of f32), then widen to
    # f32 to match the PyTorch module's output dtype.
    y = y.reshape(N, OH, OW, OC).transpose(0, 3, 1, 2)
    return y.astype(jnp.float32)


# ------------------------------- reference ---------------------------------- #
def _reference(x, weight, gamma, beta, running_mean, running_var,
               *, stride=1, eps=1e-5):
    K = weight.shape[2]
    pad = K // 2
    y = jax.lax.conv_general_dilated(
        x, weight,
        window_strides=(stride, stride),
        padding=((pad, pad), (pad, pad)),
        dimension_numbers=("NCHW", "OIHW", "NCHW"),
    )
    inv = 1.0 / jnp.sqrt(running_var + eps)
    y = (y - running_mean[None, :, None, None]) * (gamma * inv)[None, :, None, None] \
        + beta[None, :, None, None]
    return jnp.maximum(y, 0.0)


# ---------------------------------- main ------------------------------------ #
if __name__ == "__main__":
    key = jax.random.PRNGKey(0)
    N, C, H, W = 2, 4, 16, 16
    OC, K, stride = 8, 3, 1

    k1, k2 = jax.random.split(key)
    x = jax.random.normal(k1, (N, C, H, W), dtype=jnp.float32)

    # Deterministic parameters (shapes from nn.Conv2d / nn.BatchNorm2d).
    fan_in = C * K * K
    bound = 1.0 / np.sqrt(fan_in)
    weight = jax.random.uniform(k2, (OC, C, K, K), minval=-bound, maxval=bound,
                                dtype=jnp.float32)
    gamma = jnp.linspace(0.5, 1.5, OC, dtype=jnp.float32)
    beta = jnp.linspace(-0.1, 0.1, OC, dtype=jnp.float32)
    running_mean = jnp.linspace(-0.2, 0.2, OC, dtype=jnp.float32)
    running_var = jnp.linspace(0.8, 1.2, OC, dtype=jnp.float32)

    fwd = jax.jit(functools.partial(conv_bn_act, stride=stride))
    out = fwd(x, weight, gamma, beta, running_mean, running_var)
    out = jax.block_until_ready(out)

    ref = _reference(x, weight, gamma, beta, running_mean, running_var,
                     stride=stride)
    # bf16 activations/weights/output (f32 MXU accumulation) -> relaxed
    # tolerance vs the f32 reference convolution.  Acceptable for inference.
    np.testing.assert_allclose(np.asarray(out), np.asarray(ref),
                               rtol=2e-2, atol=2e-2)
    print("KERNEL_OK")
</pallas_src>

<mosaic_0001>
module attributes {stable_mosaic.version = 11 : i64} {
  func.func @_mm_bn_relu_kernel(%arg0: i32, %arg1: i32, %arg2: memref<256x128xbf16, #tpu.memory_space<vmem>>, %arg3: memref<128x128xbf16, #tpu.memory_space<vmem>>, %arg4: memref<1x128xf32, #tpu.memory_space<vmem>>, %arg5: memref<256x128xbf16, #tpu.memory_space<vmem>>) attributes {dimension_semantics = [#tpu.dimension_semantics<parallel>, #tpu.dimension_semantics<parallel>], iteration_bounds = array<i64: 2, 1>, scalar_prefetch = 0 : i64, scratch_operands = 0 : i64, tpu.core_type = #tpu.core_type<tc>, window_params = [{transform_indices = @transform_0, window_bounds = array<i64: 256, 128>}, {transform_indices = @transform_1, window_bounds = array<i64: 128, 128>}, {transform_indices = @transform_2, window_bounds = array<i64: 1, 128>}, {transform_indices = @transform_3, window_bounds = array<i64: 256, 128>}]} {
    %c0 = arith.constant 0 : index
    %c0_0 = arith.constant 0 : index
    %0 = vector.load %arg2[%c0, %c0_0] : memref<256x128xbf16, #tpu.memory_space<vmem>>, vector<256x128xbf16>
    %c0_1 = arith.constant 0 : index
    %c0_2 = arith.constant 0 : index
    %1 = vector.load %arg3[%c0_1, %c0_2] : memref<128x128xbf16, #tpu.memory_space<vmem>>, vector<128x128xbf16>
    %cst = arith.constant dense<0.000000e+00> : vector<256x128xf32>
    %2 = tpu.matmul %0, %1, %cst {dimension_numbers = #tpu.dot_dimension_numbers<[1], [0], [0], [1], [0, 0, 1, 1], [], []>} : vector<256x128xbf16>, vector<128x128xbf16>, vector<256x128xf32> -> vector<256x128xf32>
    %c0_3 = arith.constant 0 : index
    %c0_4 = arith.constant 0 : index
    %3 = vector.load %arg4[%c0_3, %c0_4] : memref<1x128xf32, #tpu.memory_space<vmem>>, vector<1x128xf32>
    %4 = vector.broadcast %3 : vector<1x128xf32> to vector<256x128xf32>
    %5 = arith.addf %2, %4 : vector<256x128xf32>
    %cst_5 = arith.constant 0.000000e+00 : f32
    %6 = vector.broadcast %cst_5 : f32 to vector<256x128xf32>
    %7 = arith.maximumf %5, %6 : vector<256x128xf32>
    %8 = arith.truncf %7 : vector<256x128xf32> to vector<256x128xbf16>
    %c0_6 = arith.constant 0 : index
    %c0_7 = arith.constant 0 : index
    %9 = vector.load %arg5[%c0_6, %c0_7] : memref<256x128xbf16, #tpu.memory_space<vmem>>, vector<256x128xbf16>
    tpu.vector_store %arg5[%c0_6, %c0_7], %8 {strides = array<i32>} : memref<256x128xbf16, #tpu.memory_space<vmem>>, vector<256x128xbf16>,
    return
  }
  func.func @transform_0(%arg0: i32, %arg1: i32) -> (i32, i32) {
    %c0_i32 = arith.constant 0 : i32
    %c0_i32_0 = arith.constant 0 : i32
    return %arg0, %c0_i32 : i32, i32
  }
  func.func @transform_1(%arg0: i32, %arg1: i32) -> (i32, i32) {
    %c0_i32 = arith.constant 0 : i32
    %c0_i32_0 = arith.constant 0 : i32
    return %c0_i32, %arg1 : i32, i32
  }
  func.func @transform_2(%arg0: i32, %arg1: i32) -> (i32, i32) {
    %c0_i32 = arith.constant 0 : i32
    %c0_i32_0 = arith.constant 0 : i32
    return %c0_i32, %arg1 : i32, i32
  }
  func.func @transform_3(%arg0: i32, %arg1: i32) -> (i32, i32) {
    %c0_i32 = arith.constant 0 : i32
    return %arg0, %arg1 : i32, i32
  }
}

</mosaic_0001>

<bundles_post_ra>
// kernel: conv_bn_act.1
= control target key start
LH: loop header
LB: loop body
LE: loop exit
PB: predicated region body
PF: predicated region fallthrough
CT: control target
= control target key end

     0   :  { %s1257_s12 = smov 0   ;;  %s1259_s13 = smov 0   ;;  %s1394_s0 = inlined_call_operand.vmem [shape: bf16[512,128], index: 0, kind: input, shape index: {}]   ;;  %s1395_s1 = inlined_call_operand.vmem [shape: bf16[128,128], index: 1, kind: input, shape index: {}]   ;;  %s1396_s2 = inlined_call_operand.vmem [shape: f32[1,128], index: 2, kind: input, shape index: {}]   ;;  %s1397_s3 = inlined_call_operand.vmem [shape: bf16[512,128], index: 3, kind: output, shape index: {}]  }
   0x1   :  { %s1261_s14 = smov 0  }
   0x2 LB: > { %s25_s15 = sadd.s32 1, %s1231_s13  ;;  %p886_p0 = scmp.ge.s32.totalorder %s1235_s14, 1  ;;  %s1235_s14 = sphi %s1261_s14, %s13_s14   ;;  %s1231_s13 = sphi %s1259_s13, %s1399_s13   ;;  %s1227_s12 = sphi %s1257_s12, %s1398_s12  }
   0x3   : > { %p27_p1 = scmp.ge.s32.totalorder %s25_s15, 2  ;;  %p169_p2 = scmp.lt.s32.totalorder %s1235_s14, 3 }
   0x5   : > { %s1401_s15 = smov (%p27_p1, %s25_s15), 0  ;;  %p170_p3 = pnand %p886_p0, %p169_p2 }
   0x6   : > { %v1189_v0 = vld [vmem:[%s1395_s1] sm:$0xff] (!%p170_p3)   ;;  %s887_s18 = sshll.u32 (!%p170_p3), %s1227_s12, 5  ;;  %v1190_v1 = vld [vmem:[%s1395_s1 + $0x8] sm:$0xff] (!%p170_p3)   ;;  %v1191_v2 = vld [vmem:[%s1395_s1 + $0x10] sm:$0xff] (!%p170_p3)  }
   0x7   : > { %173 = sbr.rel (%p170_p3) target bundleno = 285 (0x11d), region = 32  ;;  %p204_p4 = scmp.lt.s32.totalorder (!%p170_p3), %s887_s18, 63  ;;  %1101 = vmatprep.subr.bf16.mxu0 (!%p170_p3), %v1189_v0  ;;  %1149 = vmatprep.subr.bf16.mxu1 (!%p170_p3), %v1189_v0  ;;  %v1192_v3 = vld [vmem:[%s1395_s1 + $0x18] sm:$0xff] (!%p170_p3)   ;;  %v1193_v6 = vld [vmem:[%s1395_s1 + $0x20] sm:$0xff] (!%p170_p3)   ;;  %v1194_v7 = vld [vmem:[%s1395_s1 + $0x28] sm:$0xff] (!%p170_p3)  }
   0x8   : > { %1102 = vmatpush3.bf16.msra.mxu0 (!%p170_p3), %v1189_v0  ;;  %1157 = vmatpush3.bf16.msra.mxu1 (!%p170_p3), %v1189_v0  ;;  %v1195_v8 = vld [vmem:[%s1395_s1 + $0x30] sm:$0xff] (!%p170_p3)   ;;  %v1196_v9 = vld [vmem:[%s1395_s1 + $0x38] sm:$0xff] (!%p170_p3)   ;;  %v1328_v24 = vld [vmem:[%s1396_s2] ss:$0 sm:$0xff] (!%p170_p3) }
   0x9   : > { %1103 = vmatprep.subr.bf16.mxu0 (!%p170_p3), %v1190_v1  ;;  %1150 = vmatprep.subr.bf16.mxu1 (!%p170_p3), %v1190_v1 }
   0xc   : > { %1104 = vmatpush3.bf16.msra.mxu0 (!%p170_p3), %v1190_v1  ;;  %1158 = vmatpush3.bf16.msra.mxu1 (!%p170_p3), %v1190_v1 }
   0xd   : > { %1105 = vmatprep.subr.bf16.mxu0 (!%p170_p3), %v1191_v2  ;;  %1151 = vmatprep.subr.bf16.mxu1 (!%p170_p3), %v1191_v2 }
   0xe   : > { %s1403_s18 = smov (!%p204_p4, %s887_s18), 63 }
   0xf   : > { %s888_s23 = sshll.u32 %s1403_s18, 2 }
  0x10   : > { %s1292_s26 = scalar_lea.vmem %s1394_s0, %s888_s23  ;;  %1106 = vmatpush3.bf16.msra.mxu0 %v1191_v2  ;;  %1159 = vmatpush3.bf16.msra.mxu1 %v1191_v2  ;;  %s1343_s17 = scalar_lea.vmem %s1397_s3, %s888_s23 }
  0x11   : > { %v1197_v4 = vld [vmem:[%s1292_s26] sm:$0xff]   ;;  %1107 = vmatprep.subr.bf16.mxu0 %v1192_v3  ;;  %1152 = vmatprep.subr.bf16.mxu1 %v1192_v3  ;;  %v1199_v10 = vld [vmem:[%s1292_s26 + $0x8] sm:$0xff]   ;;  %v1201_v12 = vld [vmem:[%s1292_s26 + $0x10] sm:$0xff]  }
  0x12   : > { %v1198_v5 = vld [vmem:[%s1292_s26 + $0x40] sm:$0xff]   ;;  %1117 = vmatprep.mubr.bf16.mxu0 %v1197_v4  ;;  %v1200_v11 = vld [vmem:[%s1292_s26 + $0x48] sm:$0xff]   ;;  %v1202_v13 = vld [vmem:[%s1292_s26 + $0x50] sm:$0xff]  }
  0x13   : > { %1133 = vmatprep.mubr.bf16.mxu1 %v1198_v5  ;;  %v1203_v14 = vld [vmem:[%s1292_s26 + $0x18] sm:$0xff]   ;;  %v1205_v16 = vld [vmem:[%s1292_s26 + $0x20] sm:$0xff]   ;;  %v1207_v18 = vld [vmem:[%s1292_s26 + $0x28] sm:$0xff]  }
  0x14   : > { %1108 = vmatpush3.bf16.msra.mxu0 %v1192_v3  ;;  %1160 = vmatpush3.bf16.msra.mxu1 %v1192_v3  ;;  %v1204_v15 = vld [vmem:[%s1292_s26 + $0x58] sm:$0xff]   ;;  %v1206_v17 = vld [vmem:[%s1292_s26 + $0x60] sm:$0xff]   ;;  %v1208_v19 = vld [vmem:[%s1292_s26 + $0x68] sm:$0xff]  }
  0x15   : > { %1109 = vmatprep.subr.bf16.mxu0 %v1193_v6  ;;  %1153 = vmatprep.subr.bf16.mxu1 %v1193_v6  ;;  %v1209_v20 = vld [vmem:[%s1292_s26 + $0x30] sm:$0xff]   ;;  %v1211_v22 = vld [vmem:[%s1292_s26 + $0x38] sm:$0xff]  }
  0x16   : > { %v1210_v21 = vld [vmem:[%s1292_s26 + $0x70] sm:$0xff]   ;;  %v1212_v23 = vld [vmem:[%s1292_s26 + $0x78] sm:$0xff]  }
  0x18   : > { %1110 = vmatpush3.bf16.msra.mxu0 %v1193_v6  ;;  %1161 = vmatpush3.bf16.msra.mxu1 %v1193_v6 }
  0x19   : > { %1111 = vmatprep.subr.bf16.mxu0 %v1194_v7  ;;  %1154 = vmatprep.subr.bf16.mxu1 %v1194_v7 }
  0x1c   : > { %1112 = vmatpush3.bf16.msra.mxu0 %v1194_v7  ;;  %1162 = vmatpush3.bf16.msra.mxu1 %v1194_v7 }
  0x1d   : > { %1113 = vmatprep.subr.bf16.mxu0 %v1195_v8  ;;  %1155 = vmatprep.subr.bf16.mxu1 %v1195_v8 }
  0x20   : > { %1114 = vmatpush3.bf16.msra.mxu0 %v1195_v8  ;;  %1163 = vmatpush3.bf16.msra.mxu1 %v1195_v8 }
  0x21   : > { %1115 = vmatprep.subr.bf16.mxu0 %v1196_v9  ;;  %1156 = vmatprep.subr.bf16.mxu1 %v1196_v9 }
  0x24   : > { %1116 = vmatpush3.bf16.msra.mxu0 %v1196_v9  ;;  %1164 = vmatpush3.bf16.msra.mxu1 %v1196_v9 }
  0x27   : > { %1118 = vmatmul.mubr.bf16.vlgmr.msra.gmra.mrb[0].mxu0 %v1199_v10  ;;  %1134 = vmatmul.mubr.bf16.vlgmr.msra.gmra.mrb[0].mxu1 %v1200_v11 }
  0x28   : > { %1121 = vmatprep.mubr.bf16.mxu0 %v1201_v12  ;;  %1137 = vmatprep.mubr.bf16.mxu1 %v1202_v13 }
  0x2f   : > { %1122 = vmatmul.mubr.bf16.gmra.mrb[4].mxu0 %v1203_v14  ;;  %1138 = vmatmul.mubr.bf16.gmra.mrb[4].mxu1 %v1204_v15 }
  0x30   : > { %1125 = vmatprep.mubr.bf16.mxu0 %v1205_v16  ;;  %1141 = vmatprep.mubr.bf16.mxu1 %v1206_v17 }
  0x37   : > { %1126 = vmatmul.mubr.bf16.gmra.mrb[8].mxu0 %v1207_v18  ;;  %1142 = vmatmul.mubr.bf16.gmra.mrb[8].mxu1 %v1208_v19 }
  0x38   : > { %1129 = vmatprep.mubr.bf16.mxu0 %v1209_v20  ;;  %1145 = vmatprep.mubr.bf16.mxu1 %v1210_v21 }
  0x3f   : > { %1130 = vmatmul.mubr.bf16.gmra.mrb[12].mxu0 %v1211_v22  ;;  %1146 = vmatmul.mubr.bf16.gmra.mrb[12].mxu1 %v1212_v23 }
  0xfa   : > { %v1119_v25 = vpop.f32.mrb[0].mxu0  ;;  %v1135_v26 = vpop.f32.mrb[0].mxu1 }
  0xfb   : > { %v468_v27 = vadd.f32 %v1119_v25, %v1328_v24  ;;  %v532_v28 = vadd.f32 %v1135_v26, %v1328_v24  ;;  %v459_v29 = vpop.f32.mrb[1].mxu0  ;;  %v523_v30 = vpop.f32.mrb[1].mxu1 }
  0xfc   : > { %v460_v31 = vadd.f32 %v1328_v24, %v459_v29  ;;  %v524_v32 = vadd.f32 %v1328_v24, %v523_v30  ;;  %v1120_v33 = vpop.f32.mrb[2].mxu0  ;;  %v1136_v34 = vpop.f32.mrb[2].mxu1 }
  0xfd   : > { %v471_v35 = vadd.f32 %v1120_v33, %v1328_v24  ;;  %v535_v36 = vadd.f32 %v1136_v34, %v1328_v24  ;;  %v462_v37 = vpop.f32.mrb[3].mxu0  ;;  %v526_v38 = vpop.f32.mrb[3].mxu1  ;;  %v588_v41 = vmax.f32 %v468_v27, 0.0  ;;  %v604_v42 = vmax.f32 %v532_v28, 0.0 }
  0xfe   : > { %v463_v39 = vadd.f32 %v1328_v24, %v462_v37  ;;  %v527_v40 = vadd.f32 %v1328_v24, %v526_v38  ;;  %v586_v45 = vmax.f32 %v460_v31, 0.0  ;;  %v602_v46 = vmax.f32 %v524_v32, 0.0 }
  0xff   : > { %v589_v43 = vmax.f32 %v471_v35, 0.0  ;;  %v605_v44 = vmax.f32 %v535_v36, 0.0 }
 0x100   : > { %v587_v47 = vmax.f32 %v463_v39, 0.0  ;;  %v603_v48 = vmax.f32 %v527_v40, 0.0 }
 0x101   : > { %v990_v49 = vpack.c.bf16 %v589_v43, %v588_v41  ;;  %v1030_v50 = vpack.c.bf16 %v605_v44, %v604_v42 }
 0x102   : > { %v985_v51 = vpack.c.bf16 %v587_v47, %v586_v45  ;;  %v1025_v52 = vpack.c.bf16 %v603_v48, %v602_v46  ;;  %v1123_v53 = vpop.f32.mrb[4].mxu0  ;;  %v1139_v54 = vpop.f32.mrb[4].mxu1 }
 0x103   : > { %1062 = vst [vmem:[%s1343_s17 + $0x8] sm:$0xff] %v990_v49   ;;  %1070 = vst [vmem:[%s1343_s17 + $0x48] sm:$0xff] %v1030_v50   ;;  %v484_v55 = vadd.f32 %v1123_v53, %v1328_v24  ;;  %v548_v56 = vadd.f32 %v1139_v54, %v1328_v24  ;;  %v475_v57 = vpop.f32.mrb[5].mxu0  ;;  %v539_v58 = vpop.f32.mrb[5].mxu1 }
 0x104   : > { %986 = vst [vmem:[%s1343_s17] sm:$0xff] %v985_v51   ;;  %1069 = vst [vmem:[%s1343_s17 + $0x40] sm:$0xff] %v1025_v52   ;;  %v476_v59 = vadd.f32 %v1328_v24, %v475_v57  ;;  %v540_v60 = vadd.f32 %v1328_v24, %v539_v58  ;;  %v1124_v61 = vpop.f32.mrb[6].mxu0  ;;  %v1140_v62 = vpop.f32.mrb[6].mxu1 }
 0x105   : > { %v487_v63 = vadd.f32 %v1124_v61, %v1328_v24  ;;  %v551_v0 = vadd.f32 %v1140_v62, %v1328_v24  ;;  %v478_v1 = vpop.f32.mrb[7].mxu0  ;;  %v542_v2 = vpop.f32.mrb[7].mxu1  ;;  %v592_v5 = vmax.f32 %v484_v55, 0.0  ;;  %v608_v6 = vmax.f32 %v548_v56, 0.0 }
 0x106   : > { %v479_v3 = vadd.f32 %v1328_v24, %v478_v1  ;;  %v543_v4 = vadd.f32 %v1328_v24, %v542_v2  ;;  %v590_v9 = vmax.f32 %v476_v59, 0.0  ;;  %v606_v10 = vmax.f32 %v540_v60, 0.0 }
 0x107   : > { %v593_v7 = vmax.f32 %v487_v63, 0.0  ;;  %v609_v8 = vmax.f32 %v551_v0, 0.0 }
 0x108   : > { %v591_v11 = vmax.f32 %v479_v3, 0.0  ;;  %v607_v12 = vmax.f32 %v543_v4, 0.0 }
 0x109   : > { %v1000_v13 = vpack.c.bf16 %v593_v7, %v592_v5  ;;  %v1040_v14 = vpack.c.bf16 %v609_v8, %v608_v6 }
 0x10a   : > { %v995_v15 = vpack.c.bf16 %v591_v11, %v590_v9  ;;  %v1035_v16 = vpack.c.bf16 %v607_v12, %v606_v10  ;;  %v1127_v17 = vpop.f32.mrb[8].mxu0  ;;  %v1143_v18 = vpop.f32.mrb[8].mxu1 }
 0x10b   : > { %1064 = vst [vmem:[%s1343_s17 + $0x18] sm:$0xff] %v1000_v13   ;;  %1072 = vst [vmem:[%s1343_s17 + $0x58] sm:$0xff] %v1040_v14   ;;  %v500_v19 = vadd.f32 %v1127_v17, %v1328_v24  ;;  %v564_v20 = vadd.f32 %v1143_v18, %v1328_v24  ;;  %v491_v21 = vpop.f32.mrb[9].mxu0  ;;  %v555_v22 = vpop.f32.mrb[9].mxu1 }
 0x10c   : > { %1063 = vst [vmem:[%s1343_s17 + $0x10] sm:$0xff] %v995_v15   ;;  %1071 = vst [vmem:[%s1343_s17 + $0x50] sm:$0xff] %v1035_v16   ;;  %v492_v23 = vadd.f32 %v1328_v24, %v491_v21  ;;  %v556_v25 = vadd.f32 %v1328_v24, %v555_v22  ;;  %v1128_v26 = vpop.f32.mrb[10].mxu0  ;;  %v1144_v27 = vpop.f32.mrb[10].mxu1 }
 0x10d   : > { %v503_v28 = vadd.f32 %v1128_v26, %v1328_v24  ;;  %v567_v29 = vadd.f32 %v1144_v27, %v1328_v24  ;;  %v494_v30 = vpop.f32.mrb[11].mxu0  ;;  %v558_v31 = vpop.f32.mrb[11].mxu1  ;;  %v596_v34 = vmax.f32 %v500_v19, 0.0  ;;  %v612_v35 = vmax.f32 %v564_v20, 0.0 }
 0x10e   : > { %v495_v32 = vadd.f32 %v1328_v24, %v494_v30  ;;  %v559_v33 = vadd.f32 %v1328_v24, %v558_v31  ;;  %v594_v38 = vmax.f32 %v492_v23, 0.0  ;;  %v610_v39 = vmax.f32 %v556_v25, 0.0 }
 0x10f   : > { %v597_v36 = vmax.f32 %v503_v28, 0.0  ;;  %v613_v37 = vmax.f32 %v567_v29, 0.0 }
 0x110   : > { %v595_v40 = vmax.f32 %v495_v32, 0.0  ;;  %v611_v41 = vmax.f32 %v559_v33, 0.0 }
 0x111   : > { %v1010_v42 = vpack.c.bf16 %v597_v36, %v596_v34  ;;  %v1050_v43 = vpack.c.bf16 %v613_v37, %v612_v35 }
 0x112   : > { %v1005_v44 = vpack.c.bf16 %v595_v40, %v594_v38  ;;  %v1045_v45 = vpack.c.bf16 %v611_v41, %v610_v39  ;;  %v1131_v46 = vpop.f32.mrb[12].mxu0  ;;  %v1147_v47 = vpop.f32.mrb[12].mxu1 }
 0x113   : > { %1066 = vst [vmem:[%s1343_s17 + $0x28] sm:$0xff] %v1010_v42   ;;  %1074 = vst [vmem:[%s1343_s17 + $0x68] sm:$0xff] %v1050_v43   ;;  %v516_v48 = vadd.f32 %v1131_v46, %v1328_v24  ;;  %v580_v49 = vadd.f32 %v1147_v47, %v1328_v24  ;;  %v507_v50 = vpop.f32.mrb[13].mxu0  ;;  %v571_v51 = vpop.f32.mrb[13].mxu1 }
 0x114   : > { %1065 = vst [vmem:[%s1343_s17 + $0x20] sm:$0xff] %v1005_v44   ;;  %1073 = vst [vmem:[%s1343_s17 + $0x60] sm:$0xff] %v1045_v45   ;;  %v508_v52 = vadd.f32 %v1328_v24, %v507_v50  ;;  %v572_v53 = vadd.f32 %v1328_v24, %v571_v51  ;;  %v1132_v54 = vpop.f32.mrb[14].mxu0  ;;  %v1148_v55 = vpop.f32.mrb[14].mxu1 }
 0x115   : > { %v519_v56 = vadd.f32 %v1132_v54, %v1328_v24  ;;  %v583_v57 = vadd.f32 %v1148_v55, %v1328_v24  ;;  %v510_v58 = vpop.f32.mrb[15].mxu0  ;;  %v574_v59 = vpop.f32.mrb[15].mxu1  ;;  %v600_v62 = vmax.f32 %v516_v48, 0.0  ;;  %v616_v63 = vmax.f32 %v580_v49, 0.0 }
 0x116   : > { %v511_v60 = vadd.f32 %v1328_v24, %v510_v58  ;;  %v575_v61 = vadd.f32 %v1328_v24, %v574_v59  ;;  %v598_v2 = vmax.f32 %v508_v52, 0.0  ;;  %v614_v3 = vmax.f32 %v572_v53, 0.0 }
 0x117   : > { %v601_v0 = vmax.f32 %v519_v56, 0.0  ;;  %v617_v1 = vmax.f32 %v583_v57, 0.0 }
 0x118   : > { %v599_v4 = vmax.f32 %v511_v60, 0.0  ;;  %v615_v5 = vmax.f32 %v575_v61, 0.0 }
 0x119   : > { %v1020_v6 = vpack.c.bf16 %v601_v0, %v600_v62  ;;  %v1060_v7 = vpack.c.bf16 %v617_v1, %v616_v63 }
 0x11a   : > { %v1015_v8 = vpack.c.bf16 %v599_v4, %v598_v2  ;;  %v1055_v9 = vpack.c.bf16 %v615_v5, %v614_v3 }
 0x11b   : > { %1068 = vst [vmem:[%s1343_s17 + $0x38] sm:$0xff] %v1020_v6   ;;  %1076 = vst [vmem:[%s1343_s17 + $0x78] sm:$0xff] %v1060_v7  }
 0x11c   : > { %1067 = vst [vmem:[%s1343_s17 + $0x30] sm:$0xff] %v1015_v8   ;;  %1075 = vst [vmem:[%s1343_s17 + $0x70] sm:$0xff] %v1055_v9  }
 0x11d PF: > { %s13_s14 = sadd.s32 1, %s1235_s14   ;;  %s1398_s12 = smov %s1231_s13 }
 0x11e   : > { %p10_p5 = scmp.ge.s32.totalorder %s13_s14, 4   ;;  %s1399_s13 = smov %s1401_s15 }
 0x120   :  { %12 = sbr.rel (!%p10_p5) target bundleno = 2 (0x2), region = 68 }

</bundles_post_ra>
